<compile_context>
chip_gen: v7x
topology: tpu7x:2x2x1
jax: 0.10.0
libtpu: 0.0.40
codegen_flags: <defaults>
</compile_context>

<pallas_src>
import functools

import jax
import jax.numpy as jnp
from jax.experimental import pallas as pl
from jax.experimental.pallas import tpu as pltpu


# ----------------------------------------------------------------------------- kernel
def gin_fused_kernel(ids_ref, vals_ref, adj_ref, params_ref, out_ref, *,
                     emb_off, emb_shape, layer_offs, layer_dims, negative_slope):
    n = adj_ref.shape[0]
    f_sz, e_dim = emb_shape

    # ---- embedding lookup: one-hot MXU matmul (no XLA gather kernel) ----------
    ids = ids_ref[...]                                               # [N, 1] int32
    col = jax.lax.broadcasted_iota(jnp.int32, (n, f_sz), 1)          # [N, F]
    onehot = (col == ids).astype(jnp.float32)                        # [N, F]
    emb = params_ref[emb_off:emb_off + f_sz, 0:e_dim]                # [F, E]
    h = jnp.dot(onehot, emb, preferred_element_type=jnp.float32)     # == emb[ids]
    h = h * vals_ref[...]                                            # [N, E]

    # ---- adjacency prep, hoisted out of the layer loop ------------------------
    adj = adj_ref[...].astype(jnp.float32)                           # [N, N] 0/1
    neg_mask = (adj - 1.0) * jnp.float32(1e30)                       # 0 on edges, -1e30 off

    num_layers = len(layer_dims)
    for l in range(num_layers):
        f_in, d = layer_dims[l]
        w_off, b_off = layer_offs[l]
        w_aug = params_ref[w_off:w_off + f_in, 0:d + 2]              # [F_in, D+2]
        bias = params_ref[b_off:b_off + 1, 0:d]                      # [1, D]

        # fused feature + attention projection
        hz = jnp.dot(h, w_aug, preferred_element_type=jnp.float32)   # [N, D+2]
        z = hz[:, 0:d]                                               # [N, D]
        el = hz[:, d:d + 1]                                          # a_l . z  (src term)
        er = hz[:, d + 1:d + 2]                                      # a_r . z  (dst term)

        # e[dst, src] = LeakyReLU(a_r.z_dst + a_l.z_src), additive -1e30 mask
        e = er + el.T                                                # [N(dst), N(src)]
        e = jnp.where(e > 0, e, jnp.float32(negative_slope) * e)
        e = e + neg_mask

        # masked edge softmax over incoming edges (axis=1)
        m = jnp.max(e, axis=1, keepdims=True)
        p = jnp.exp(e - m) * adj
        denom = jnp.maximum(jnp.sum(p, axis=1, keepdims=True), jnp.float32(1e-20))
        alpha = p * pl.reciprocal(denom, approx=True)

        h = jnp.dot(alpha, z, preferred_element_type=jnp.float32) + bias   # [N, D]
        if l < num_layers - 1:                                       # ELU on hidden layers
            h = jnp.where(h > 0, h, jnp.exp(jnp.minimum(h, 0.0)) - 1.0)

    # ---- torch: logits = last_layer_out.mean(2) -> [N, 1], fused in-kernel ----
    d_last = layer_dims[-1][1]
    out_ref[...] = (jnp.sum(h, axis=1, keepdims=True) *
                    jnp.float32(1.0 / d_last)).astype(out_ref.dtype)


# ----------------------------------------------------------------------------- host-side packing
def pack_params(emb_table, layer_params, lanes=128):
    """Pack embedding table + per-layer (W_aug, bias) into one [R, 128] f32 slab.

    Each section is padded to a multiple of 8 rows so every in-kernel slice is
    sublane-aligned.  W_aug = [W | W @ a_l^T | W @ a_r^T].
    """
    def rpad(r):
        return ((r + 7) // 8) * 8

    blocks, row = [], 0

    def add(x):
        nonlocal row
        r, c = x.shape
        assert c <= lanes
        blocks.append(jnp.pad(x.astype(jnp.float32), ((0, rpad(r) - r), (0, lanes - c))))
        off = row
        row += rpad(r)
        return off

    emb_off = add(emb_table)
    layer_offs, layer_dims = [], []
    for (w, a_l, a_r, b) in layer_params:
        f_in, d = w.shape
        a_lr = jnp.concatenate([a_l, a_r], axis=0).T                 # [D, 2]
        w_aug = jnp.concatenate([w, jnp.dot(w, a_lr)], axis=1)       # [F_in, D+2]
        w_off = add(w_aug)
        b_off = add(b)
        layer_offs.append((w_off, b_off))
        layer_dims.append((f_in, d))

    slab = jnp.concatenate(blocks, axis=0)                           # [R, 128]
    return slab, emb_off, tuple(layer_offs), tuple(layer_dims)


# ----------------------------------------------------------------------------- wrapper
def gin_forward(features, feature_values, adj_i8, param_slab, *,
                emb_off, emb_shape, layer_offs, layer_dims, negative_slope=0.2):
    """Full GIN forward (embedding -> 3 GATConv -> mean) in one pallas_call."""
    n = adj_i8.shape[0]
    ids = features[0].reshape(n, 1).astype(jnp.int32)                # batch index 0 only
    vals = feature_values[0].reshape(n, 1).astype(jnp.float32)

    kernel = functools.partial(
        gin_fused_kernel,
        emb_off=emb_off, emb_shape=emb_shape,
        layer_offs=layer_offs, layer_dims=layer_dims,
        negative_slope=negative_slope)

    vmem = pl.BlockSpec(memory_space=pltpu.MemorySpace.VMEM)
    logits = pl.pallas_call(
        kernel,
        out_shape=jax.ShapeDtypeStruct((n, 1), jnp.float32),
        in_specs=[vmem, vmem, vmem, vmem],
        out_specs=vmem,
        compiler_params=pltpu.CompilerParams(vmem_limit_bytes=32 * 1024 * 1024),
    )(ids, vals, adj_i8, param_slab)
    return logits                                                    # [N, 1]


# ----------------------------------------------------------------------------- pure-JAX reference
def gin_reference(features, feature_values, emb_table, adj_f32, layer_params, negative_slope):
    h = emb_table[features[0]] * feature_values[0][:, None]
    num = len(layer_params)
    for l, (w, a_l, a_r, b) in enumerate(layer_params):
        z = h @ w
        el = z @ a_l[0]                                              # [N] src term
        er = z @ a_r[0]                                              # [N] dst term
        e = er[:, None] + el[None, :]
        e = jnp.where(e > 0, e, negative_slope * e)
        e = jnp.where(adj_f32 > 0, e, -jnp.inf)
        alpha = jax.nn.softmax(e, axis=1)
        h = alpha @ z + b
        if l < num - 1:
            h = jax.nn.elu(h)
    return jnp.mean(h, axis=1, keepdims=True)                        # [N, 1]


# ----------------------------------------------------------------------------- driver
if __name__ == "__main__":
    key = jax.random.PRNGKey(0)

    feature_size = 50
    field_size = 8            # N graph nodes
    embedding_size = 8
    num_hidden = 32
    num_layers = 2            # hidden GAT layers; +1 final output GAT layer
    heads = [1, 1, 1]
    negative_slope = 0.2
    batch = 2

    keys = jax.random.split(key, 12)

    # Embedding table.
    emb_table = 0.1 * jax.random.normal(keys[0], (feature_size, embedding_size), jnp.float32)

    # GAT layer parameters: layer 0, layer 1, final layer.
    dims_in = [embedding_size, num_hidden * heads[0], num_hidden * heads[1]]
    dims_out = [num_hidden, num_hidden, embedding_size]
    layer_params = []
    for i in range(3):
        kw, ka, kr = jax.random.split(keys[1 + i], 3)
        W = 0.1 * jax.random.normal(kw, (dims_in[i], dims_out[i]), jnp.float32)
        a_l = 0.1 * jax.random.normal(ka, (1, dims_out[i]), jnp.float32)
        a_r = 0.1 * jax.random.normal(kr, (1, dims_out[i]), jnp.float32)
        b = jnp.zeros((1, dims_out[i]), jnp.float32)                 # DGL bias init = 0
        layer_params.append((W, a_l, a_r, b))

    # Deterministic graph g: ring + self loops, adj[dst, src].
    N = field_size
    src = jnp.arange(N)
    dst = (src + 1) % N
    adj_f32 = jnp.eye(N, dtype=jnp.float32)
    adj_f32 = adj_f32.at[dst, src].set(1.0)
    adj_f32 = adj_f32.at[src, dst].set(1.0)
    adj_i8 = adj_f32.astype(jnp.int8)                                # 4x smaller in HBM/VMEM

    # Inputs.
    features = jax.random.randint(keys[10], (batch, field_size), 0, feature_size, jnp.int32)
    feature_values = jax.random.uniform(keys[11], (batch, field_size), jnp.float32)

    # Host-side one-time parameter packing (W_aug fold + single slab).
    slab, emb_off, layer_offs, layer_dims = pack_params(emb_table, layer_params)

    fwd = jax.jit(functools.partial(
        gin_forward,
        emb_off=emb_off, emb_shape=tuple(emb_table.shape),
        layer_offs=layer_offs, layer_dims=layer_dims,
        negative_slope=negative_slope))

    logits = fwd(features, feature_values, adj_i8, slab)             # [N, 1]
    jax.block_until_ready(logits)

    # Correctness guard against a pure-JAX reference (loose tol: approx reciprocal).
    logits_ref = gin_reference(features, feature_values, emb_table, adj_f32,
                               layer_params, negative_slope)
    if not jnp.allclose(logits, logits_ref, atol=1e-4, rtol=5e-2):
        raise AssertionError(
            f"mismatch vs reference, max abs err = {jnp.max(jnp.abs(logits - logits_ref))}")

    print("KERNEL_OK")
</pallas_src>

<mosaic_0001>
module attributes {stable_mosaic.version = 11 : i64} {
  func.func @gin_fused_kernel(%arg0: memref<8x1xi32, #tpu.memory_space<vmem>>, %arg1: memref<8x1xf32, #tpu.memory_space<vmem>>, %arg2: memref<8x8xi8, #tpu.memory_space<vmem>>, %arg3: memref<152x128xf32, #tpu.memory_space<vmem>>, %arg4: memref<8x1xf32, #tpu.memory_space<vmem>>) attributes {dimension_semantics = [], scalar_prefetch = 0 : i64, scratch_operands = 0 : i64, tpu.core_type = #tpu.core_type<tc>} {
    %c0 = arith.constant 0 : index
    %c0_0 = arith.constant 0 : index
    %0 = vector.load %arg0[%c0, %c0_0] : memref<8x1xi32, #tpu.memory_space<vmem>>, vector<8x1xi32>
    %1 = tpu.iota {dimensions = array<i32: 1>} : vector<8x50xi32>
    %2 = vector.broadcast %0 : vector<8x1xi32> to vector<8x50xi32>
    %3 = arith.cmpi eq, %1, %2 : vector<8x50xi32>
    %4 = arith.extui %3 : vector<8x50xi1> to vector<8x50xi32>
    %5 = arith.sitofp %4 : vector<8x50xi32> to vector<8x50xf32>
    %c0_1 = arith.constant 0 : index
    %c0_2 = arith.constant 0 : index
    %6 = vector.load %arg3[%c0_1, %c0_2] : memref<152x128xf32, #tpu.memory_space<vmem>>, vector<50x8xf32>
    %cst = arith.constant dense<0.000000e+00> : vector<8x8xf32>
    %7 = tpu.matmul %5, %6, %cst {dimension_numbers = #tpu.dot_dimension_numbers<[1], [0], [0], [1], [0, 0, 1, 1], [], []>} : vector<8x50xf32>, vector<50x8xf32>, vector<8x8xf32> -> vector<8x8xf32>
    %c0_3 = arith.constant 0 : index
    %c0_4 = arith.constant 0 : index
    %8 = vector.load %arg1[%c0_3, %c0_4] : memref<8x1xf32, #tpu.memory_space<vmem>>, vector<8x1xf32>
    %9 = vector.broadcast %8 : vector<8x1xf32> to vector<8x8xf32>
    %10 = arith.mulf %7, %9 : vector<8x8xf32>
    %c0_5 = arith.constant 0 : index
    %c0_6 = arith.constant 0 : index
    %11 = vector.load %arg2[%c0_5, %c0_6] : memref<8x8xi8, #tpu.memory_space<vmem>>, vector<8x8xi8>
    %12 = arith.sitofp %11 : vector<8x8xi8> to vector<8x8xf32>
    %cst_7 = arith.constant 1.000000e+00 : f32
    %13 = vector.broadcast %cst_7 : f32 to vector<8x8xf32>
    %14 = arith.subf %12, %13 : vector<8x8xf32>
    %cst_8 = arith.constant 1.000000e+30 : f32
    %15 = vector.broadcast %cst_8 : f32 to vector<8x8xf32>
    %16 = arith.mulf %14, %15 : vector<8x8xf32>
    %c56 = arith.constant 56 : index
    %c0_9 = arith.constant 0 : index
    %17 = vector.load %arg3[%c56, %c0_9] : memref<152x128xf32, #tpu.memory_space<vmem>>, vector<8x34xf32>
    %c64 = arith.constant 64 : index
    %c0_10 = arith.constant 0 : index
    %18 = vector.load %arg3[%c64, %c0_10] : memref<152x128xf32, #tpu.memory_space<vmem>>, vector<1x32xf32>
    %cst_11 = arith.constant dense<0.000000e+00> : vector<8x34xf32>
    %19 = tpu.matmul %10, %17, %cst_11 {dimension_numbers = #tpu.dot_dimension_numbers<[1], [0], [0], [1], [0, 0, 1, 1], [], []>} : vector<8x8xf32>, vector<8x34xf32>, vector<8x34xf32> -> vector<8x34xf32>
    %20 = vector.extract_strided_slice %19 {offsets = [0, 0], sizes = [8, 32], strides = [1, 1]} : vector<8x34xf32> to vector<8x32xf32>
    %21 = vector.extract_strided_slice %19 {offsets = [0, 32], sizes = [8, 1], strides = [1, 1]} : vector<8x34xf32> to vector<8x1xf32>
    %22 = vector.extract_strided_slice %19 {offsets = [0, 33], sizes = [8, 1], strides = [1, 1]} : vector<8x34xf32> to vector<8x1xf32>
    %23 = tpu.transpose %21, [1, 0] : vector<8x1xf32> -> vector<1x8xf32>
    %24 = vector.broadcast %22 : vector<8x1xf32> to vector<8x8xf32>
    %25 = vector.broadcast %23 : vector<1x8xf32> to vector<8x8xf32>
    %26 = arith.addf %24, %25 : vector<8x8xf32>
    %cst_12 = arith.constant 0.000000e+00 : f32
    %27 = vector.broadcast %cst_12 : f32 to vector<8x8xf32>
    %28 = arith.cmpf ogt, %26, %27 : vector<8x8xf32>
    %cst_13 = arith.constant 2.000000e-01 : f32
    %29 = vector.broadcast %cst_13 : f32 to vector<8x8xf32>
    %30 = arith.mulf %29, %26 : vector<8x8xf32>
    %31 = arith.select %28, %26, %30 : vector<8x8xi1>, vector<8x8xf32>
    %32 = arith.addf %31, %16 : vector<8x8xf32>
    %cst_14 = arith.constant dense<0xFF800000> : vector<8xf32>
    %33 = vector.multi_reduction <maximumf>, %32, %cst_14 [1] : vector<8x8xf32> to vector<8xf32>
    %34 = vector.shape_cast %33 : vector<8xf32> to vector<8x1xf32>
    %35 = vector.broadcast %34 : vector<8x1xf32> to vector<8x8xf32>
    %36 = arith.subf %32, %35 : vector<8x8xf32>
    %37 = math.exp %36 : vector<8x8xf32>
    %38 = arith.mulf %37, %12 : vector<8x8xf32>
    %cst_15 = arith.constant dense<0.000000e+00> : vector<8xf32>
    %39 = vector.multi_reduction <add>, %38, %cst_15 [1] : vector<8x8xf32> to vector<8xf32>
    %40 = vector.shape_cast %39 : vector<8xf32> to vector<8x1xf32>
    %cst_16 = arith.constant 9.99999968E-21 : f32
    %41 = vector.broadcast %cst_16 : f32 to vector<8x1xf32>
    %42 = arith.maximumf %40, %41 : vector<8x1xf32>
    %43 = tpu.reciprocal %42 {approx = true} : vector<8x1xf32> -> vector<8x1xf32>
    %44 = vector.broadcast %43 : vector<8x1xf32> to vector<8x8xf32>
    %45 = arith.mulf %38, %44 : vector<8x8xf32>
    %cst_17 = arith.constant dense<0.000000e+00> : vector<8x32xf32>
    %46 = tpu.matmul %45, %20, %cst_17 {dimension_numbers = #tpu.dot_dimension_numbers<[1], [0], [0], [1], [0, 0, 1, 1], [], []>} : vector<8x8xf32>, vector<8x32xf32>, vector<8x32xf32> -> vector<8x32xf32>
    %47 = vector.broadcast %18 : vector<1x32xf32> to vector<8x32xf32>
    %48 = arith.addf %46, %47 : vector<8x32xf32>
    %cst_18 = arith.constant 0.000000e+00 : f32
    %49 = vector.broadcast %cst_18 : f32 to vector<8x32xf32>
    %50 = arith.cmpf ogt, %48, %49 : vector<8x32xf32>
    %cst_19 = arith.constant 0.000000e+00 : f32
    %51 = vector.broadcast %cst_19 : f32 to vector<8x32xf32>
    %52 = arith.minimumf %48, %51 : vector<8x32xf32>
    %53 = math.exp %52 : vector<8x32xf32>
    %cst_20 = arith.constant 1.000000e+00 : f32
    %54 = vector.broadcast %cst_20 : f32 to vector<8x32xf32>
    %55 = arith.subf %53, %54 : vector<8x32xf32>
    %56 = arith.select %50, %48, %55 : vector<8x32xi1>, vector<8x32xf32>
    %c72 = arith.constant 72 : index
    %c0_21 = arith.constant 0 : index
    %57 = vector.load %arg3[%c72, %c0_21] : memref<152x128xf32, #tpu.memory_space<vmem>>, vector<32x34xf32>
    %c104 = arith.constant 104 : index
    %c0_22 = arith.constant 0 : index
    %58 = vector.load %arg3[%c104, %c0_22] : memref<152x128xf32, #tpu.memory_space<vmem>>, vector<1x32xf32>
    %cst_23 = arith.constant dense<0.000000e+00> : vector<8x34xf32>
    %59 = tpu.matmul %56, %57, %cst_23 {dimension_numbers = #tpu.dot_dimension_numbers<[1], [0], [0], [1], [0, 0, 1, 1], [], []>} : vector<8x32xf32>, vector<32x34xf32>, vector<8x34xf32> -> vector<8x34xf32>
    %60 = vector.extract_strided_slice %59 {offsets = [0, 0], sizes = [8, 32], strides = [1, 1]} : vector<8x34xf32> to vector<8x32xf32>
    %61 = vector.extract_strided_slice %59 {offsets = [0, 32], sizes = [8, 1], strides = [1, 1]} : vector<8x34xf32> to vector<8x1xf32>
    %62 = vector.extract_strided_slice %59 {offsets = [0, 33], sizes = [8, 1], strides = [1, 1]} : vector<8x34xf32> to vector<8x1xf32>
    %63 = tpu.transpose %61, [1, 0] : vector<8x1xf32> -> vector<1x8xf32>
    %64 = vector.broadcast %62 : vector<8x1xf32> to vector<8x8xf32>
    %65 = vector.broadcast %63 : vector<1x8xf32> to vector<8x8xf32>
    %66 = arith.addf %64, %65 : vector<8x8xf32>
    %cst_24 = arith.constant 0.000000e+00 : f32
    %67 = vector.broadcast %cst_24 : f32 to vector<8x8xf32>
    %68 = arith.cmpf ogt, %66, %67 : vector<8x8xf32>
    %cst_25 = arith.constant 2.000000e-01 : f32
    %69 = vector.broadcast %cst_25 : f32 to vector<8x8xf32>
    %70 = arith.mulf %69, %66 : vector<8x8xf32>
    %71 = arith.select %68, %66, %70 : vector<8x8xi1>, vector<8x8xf32>
    %72 = arith.addf %71, %16 : vector<8x8xf32>
    %cst_26 = arith.constant dense<0xFF800000> : vector<8xf32>
    %73 = vector.multi_reduction <maximumf>, %72, %cst_26 [1] : vector<8x8xf32> to vector<8xf32>
    %74 = vector.shape_cast %73 : vector<8xf32> to vector<8x1xf32>
    %75 = vector.broadcast %74 : vector<8x1xf32> to vector<8x8xf32>
    %76 = arith.subf %72, %75 : vector<8x8xf32>
    %77 = math.exp %76 : vector<8x8xf32>
    %78 = arith.mulf %77, %12 : vector<8x8xf32>
    %cst_27 = arith.constant dense<0.000000e+00> : vector<8xf32>
    %79 = vector.multi_reduction <add>, %78, %cst_27 [1] : vector<8x8xf32> to vector<8xf32>
    %80 = vector.shape_cast %79 : vector<8xf32> to vector<8x1xf32>
    %cst_28 = arith.constant 9.99999968E-21 : f32
    %81 = vector.broadcast %cst_28 : f32 to vector<8x1xf32>
    %82 = arith.maximumf %80, %81 : vector<8x1xf32>
    %83 = tpu.reciprocal %82 {approx = true} : vector<8x1xf32> -> vector<8x1xf32>
    %84 = vector.broadcast %83 : vector<8x1xf32> to vector<8x8xf32>
    %85 = arith.mulf %78, %84 : vector<8x8xf32>
    %cst_29 = arith.constant dense<0.000000e+00> : vector<8x32xf32>
    %86 = tpu.matmul %85, %60, %cst_29 {dimension_numbers = #tpu.dot_dimension_numbers<[1], [0], [0], [1], [0, 0, 1, 1], [], []>} : vector<8x8xf32>, vector<8x32xf32>, vector<8x32xf32> -> vector<8x32xf32>
    %87 = vector.broadcast %58 : vector<1x32xf32> to vector<8x32xf32>
    %88 = arith.addf %86, %87 : vector<8x32xf32>
    %cst_30 = arith.constant 0.000000e+00 : f32
    %89 = vector.broadcast %cst_30 : f32 to vector<8x32xf32>
    %90 = arith.cmpf ogt, %88, %89 : vector<8x32xf32>
    %cst_31 = arith.constant 0.000000e+00 : f32
    %91 = vector.broadcast %cst_31 : f32 to vector<8x32xf32>
    %92 = arith.minimumf %88, %91 : vector<8x32xf32>
    %93 = math.exp %92 : vector<8x32xf32>
    %cst_32 = arith.constant 1.000000e+00 : f32
    %94 = vector.broadcast %cst_32 : f32 to vector<8x32xf32>
    %95 = arith.subf %93, %94 : vector<8x32xf32>
    %96 = arith.select %90, %88, %95 : vector<8x32xi1>, vector<8x32xf32>
    %c112 = arith.constant 112 : index
    %c0_33 = arith.constant 0 : index
    %97 = vector.load %arg3[%c112, %c0_33] : memref<152x128xf32, #tpu.memory_space<vmem>>, vector<32x10xf32>
    %c144 = arith.constant 144 : index
    %c0_34 = arith.constant 0 : index
    %98 = vector.load %arg3[%c144, %c0_34] : memref<152x128xf32, #tpu.memory_space<vmem>>, vector<1x8xf32>
    %cst_35 = arith.constant dense<0.000000e+00> : vector<8x10xf32>
    %99 = tpu.matmul %96, %97, %cst_35 {dimension_numbers = #tpu.dot_dimension_numbers<[1], [0], [0], [1], [0, 0, 1, 1], [], []>} : vector<8x32xf32>, vector<32x10xf32>, vector<8x10xf32> -> vector<8x10xf32>
    %100 = vector.extract_strided_slice %99 {offsets = [0, 0], sizes = [8, 8], strides = [1, 1]} : vector<8x10xf32> to vector<8x8xf32>
    %101 = vector.extract_strided_slice %99 {offsets = [0, 8], sizes = [8, 1], strides = [1, 1]} : vector<8x10xf32> to vector<8x1xf32>
    %102 = vector.extract_strided_slice %99 {offsets = [0, 9], sizes = [8, 1], strides = [1, 1]} : vector<8x10xf32> to vector<8x1xf32>
    %103 = tpu.transpose %101, [1, 0] : vector<8x1xf32> -> vector<1x8xf32>
    %104 = vector.broadcast %102 : vector<8x1xf32> to vector<8x8xf32>
    %105 = vector.broadcast %103 : vector<1x8xf32> to vector<8x8xf32>
    %106 = arith.addf %104, %105 : vector<8x8xf32>
    %cst_36 = arith.constant 0.000000e+00 : f32
    %107 = vector.broadcast %cst_36 : f32 to vector<8x8xf32>
    %108 = arith.cmpf ogt, %106, %107 : vector<8x8xf32>
    %cst_37 = arith.constant 2.000000e-01 : f32
    %109 = vector.broadcast %cst_37 : f32 to vector<8x8xf32>
    %110 = arith.mulf %109, %106 : vector<8x8xf32>
    %111 = arith.select %108, %106, %110 : vector<8x8xi1>, vector<8x8xf32>
    %112 = arith.addf %111, %16 : vector<8x8xf32>
    %cst_38 = arith.constant dense<0xFF800000> : vector<8xf32>
    %113 = vector.multi_reduction <maximumf>, %112, %cst_38 [1] : vector<8x8xf32> to vector<8xf32>
    %114 = vector.shape_cast %113 : vector<8xf32> to vector<8x1xf32>
    %115 = vector.broadcast %114 : vector<8x1xf32> to vector<8x8xf32>
    %116 = arith.subf %112, %115 : vector<8x8xf32>
    %117 = math.exp %116 : vector<8x8xf32>
    %118 = arith.mulf %117, %12 : vector<8x8xf32>
    %cst_39 = arith.constant dense<0.000000e+00> : vector<8xf32>
    %119 = vector.multi_reduction <add>, %118, %cst_39 [1] : vector<8x8xf32> to vector<8xf32>
    %120 = vector.shape_cast %119 : vector<8xf32> to vector<8x1xf32>
    %cst_40 = arith.constant 9.99999968E-21 : f32
    %121 = vector.broadcast %cst_40 : f32 to vector<8x1xf32>
    %122 = arith.maximumf %120, %121 : vector<8x1xf32>
    %123 = tpu.reciprocal %122 {approx = true} : vector<8x1xf32> -> vector<8x1xf32>
    %124 = vector.broadcast %123 : vector<8x1xf32> to vector<8x8xf32>
    %125 = arith.mulf %118, %124 : vector<8x8xf32>
    %cst_41 = arith.constant dense<0.000000e+00> : vector<8x8xf32>
    %126 = tpu.matmul %125, %100, %cst_41 {dimension_numbers = #tpu.dot_dimension_numbers<[1], [0], [0], [1], [0, 0, 1, 1], [], []>} : vector<8x8xf32>, vector<8x8xf32>, vector<8x8xf32> -> vector<8x8xf32>
    %127 = vector.broadcast %98 : vector<1x8xf32> to vector<8x8xf32>
    %128 = arith.addf %126, %127 : vector<8x8xf32>
    %cst_42 = arith.constant dense<0.000000e+00> : vector<8xf32>
    %129 = vector.multi_reduction <add>, %128, %cst_42 [1] : vector<8x8xf32> to vector<8xf32>
    %130 = vector.shape_cast %129 : vector<8xf32> to vector<8x1xf32>
    %cst_43 = arith.constant 1.250000e-01 : f32
    %131 = vector.broadcast %cst_43 : f32 to vector<8x1xf32>
    %132 = arith.mulf %130, %131 : vector<8x1xf32>
    %c0_44 = arith.constant 0 : index
    %c0_45 = arith.constant 0 : index
    %133 = vector.load %arg4[%c0_44, %c0_45] : memref<8x1xf32, #tpu.memory_space<vmem>>, vector<8x1xf32>
    tpu.vector_store %arg4[%c0_44, %c0_45], %132 {strides = array<i32>} : memref<8x1xf32, #tpu.memory_space<vmem>>, vector<8x1xf32>,
    return
  }
}

</mosaic_0001>

<bundles_post_ra>
// kernel: gin_forward.1
= control target key start
LH: loop header
LB: loop body
LE: loop exit
PB: predicated region body
PF: predicated region fallthrough
CT: control target
= control target key end

     0   :  { %9 = vsyncpa [#allocation3], 0  ;;  %s986_s15 = smov [#allocation2]   ;;  %s1104_s0 = inlined_call_operand.vmem [shape: s32[8,1], index: 0, kind: input, shape index: {}]   ;;  %s1105_s1 = inlined_call_operand.vmem [shape: f32[8,1], index: 1, kind: input, shape index: {}]   ;;  %s1106_s2 = inlined_call_operand.vmem [shape: s8[8,8], index: 2, kind: input, shape index: {}]   ;;  %s1107_s3 = inlined_call_operand.hbm [shape: f32[152,128], index: 3, kind: input, shape index: {}]   ;;  %s1108_s4 = inlined_call_operand.vmem [shape: f32[8,1], index: 4, kind: output, shape index: {}]  }
   0x1   :  { %s21_s16 = sshll.u32 %s986_s15, 4  ;;  %s962_s19 = scalar_lea.hbm %s1107_s3, 2432  ;;  %s22_s16 = int_to_ptr.vmem [resolvable:$true] %s21_s16 }
   0x2   :  { %p963_p0 = scmp.ne.s32.totalorder %s1107_s3, %s962_s19  ;;  %p966_p1 = scmp.lt.u32.totalorder %s962_s19, %s1107_s3 }
   0x4   :  { %p968_p2 = pnand %p966_p1, %p963_p0 }
   0x6   :  { %971 = shalt.err (!%p968_p2)
}
   0x7   :  { %s972_s24 = scalar_lea.vmem %s22_s16, 2432  ;;  %p977_p4 = scmp.lt.s32.totalorder %s22_s16, %s22_s16 }
   0x8   :  { %p973_p3 = scmp.ne.s32.totalorder %s22_s16, %s972_s24  ;;  %p978_p5 = scmp.lt.s32.totalorder %s972_s24, %s972_s24 }
   0xa   :  { %p979_p6 = por %p978_p5, %p977_p4 }
   0xc   :  { %p980_p7 = pnand %p979_p6, %p973_p3 }
   0xe   :  { %983 = shalt.err (!%p980_p7)
}
   0xf   :  { %s987_s25 = smov 128   ;;  %s988_s26 = smov 8  }
  0x10   :  { %27 = dma.hbm_to_vmem [thread:$0]  %s1107_s3, 2432, %s22_s16, [#allocation3], %s987_s25, %s987_s25, %s988_s26  }
  0x11   :  { %984 = dma.done.wait [#allocation3], 2432  }
  0x12   :  { %985 = vsyncadd [#allocation3], 4294964864  ;;  %v989_v0 = vmov 0   ;;  %v990_v1 = vmov 0.0|0.0   ;;  %v991_v2 = vmov 0.0   ;;  %v31_v3 = vld [vmem:[%s1104_s0] sm:$0xff]  ;;  %v32_v15 = vlaneseq }
  0x13   :  { %942 = vset.pattern.permute.xlu0 %v989_v0  ;;  %910 = vmatprep.subr.bf16.mxu0 %v990_v1  ;;  %v40_v4 = vld [vmem:[#allocation2] sm:$0xff]  ;;  %v41_v5 = vld [vmem:[#allocation2 + $0x8] sm:$0xff]  ;;  %v42_v6 = vld [vmem:[#allocation2 + $0x10] sm:$0xff]  ;;  %vm992_vm0 = vmmov 0   ;;  %vm51_vm1 = vcmask 1041408   ;;  %vm47_vm2 = vcmask 408576  }
  0x14   :  { %868 = vmatprep.subr.mxu1 %v991_v2  ;;  %35 = vperm.xlu0 %942, %v31_v3   ;;  %v43_v7 = vld [vmem:[#allocation2 + $0x18] sm:$0xff]  ;;  %v125_v8 = vld [vmem:[%s1105_s1] sm:$0xff]  ;;  %v911_v9 = vpack.c.bf16 %v41_v5, %v40_v4  ;;  %v45_v12 = vld [vmem:[#allocation2 + $0x28] sm:$0xff]  ;;  %v33_v16 = vand.u32 127, %v32_v15  ;;  %vm139_vm4 = vcmask 64512   ;;  %v993_v24 = vmov 33  }
  0x15   :  { %865 = vmatprep.mubr.msk.f32.mxu0 %vm992_vm0, %v991_v2  ;;  %870 = vmatprep.mubr.msk.f32.mxu1 %vm992_vm0, %v991_v2  ;;  %v914_v10 = vpack.c.bf16 %v43_v7, %v42_v6  ;;  %v44_v11 = vld [vmem:[#allocation2 + $0x20] sm:$0xff]  ;;  %v46_v14 = vld [vmem:[#allocation2 + $0x30] sm:$0x3]  ;;  %v137_v19 = vld [vmem:[#allocation2 + $0x38] sm:$0xff]  ;;  %s994_s0 = smov 96   ;;  %v254_v30 = vshrl.u32 %v32_v15, 7 }
  0x16   :  { %912 = vmatpush3.bf16.msra.mxu0 %v911_v9  ;;  %v917_v13 = vpack.c.bf16 %v45_v12, %v44_v11  ;;  %869 = vmatpush3.msra.mxu1 %v137_v19  ;;  %v132_v28 = vld [vmem:[%s1106_s2] sm:$0x3]  ;;  %v358_v53 = vld [vmem:[#allocation2 + $0x48] sm:$0xff]  ;;  %v359_v54 = vld [vmem:[#allocation2 + $0x50] sm:$0xff]  ;;  %vm363_vm6 = vcmask 261120   ;;  %s996_s2 = smov 120  }
  0x17   :  { %913 = vmatprep.subr.bf16.mxu0 %v990_v1  ;;  %873 = vmatprep.subr.mxu1 %v991_v2  ;;  %v133_v29 = vunpack.c.0.s8 %v132_v28  ;;  %v1064_v32 = vsub.s32 0, %v254_v30  ;;  %v920_v55 = vpack.c.bf16 %v359_v54, %v358_v53  ;;  %v360_v56 = vld [vmem:[#allocation2 + $0x58] sm:$0xff]  ;;  %v361_v57 = vld [vmem:[#allocation2 + $0x60] sm:$0xff]  ;;  %vm803_vm11 = vcmask 7168  }
  0x18   :  { %128 = vperm.xlu0 %942, %v125_v8   ;;  %943 = vset.pattern.permute.xlu1 %v993_v24  ;;  %v923_v58 = vpack.c.bf16 %v361_v57, %v360_v56  ;;  %v815_v59 = vld [vmem:[#allocation2 + $0x40] ss:$0 sm:$0xff]  ;;  %v583_v28 = vld [vmem:[#allocation2 + $0x78] sm:$0xff] }
  0x19   :  { %v1062_v31 = vcvt.s32.f32 %v133_v29  ;;  %v584_v30 = vld [vmem:[#allocation2 + $0x80] sm:$0xff] }
  0x1a   :  { %915 = vmatpush3.bf16.msra.mxu0 %v914_v10 }
  0x1b   :  { %916 = vmatprep.subr.bf16.mxu0 %v990_v1  ;;  %v813_v34 = vadd.f32 -1.0, %v1062_v31 }
  0x1d   :  { %v1068_v38 = vmul.f32 1e+30, %v813_v34 }
  0x1e   :  { %918 = vmatpush3.bf16.msra.mxu0 %v917_v13 }
  0x1f   :  { %863 = vmatprep.subr.mxu0 %v991_v2 }
  0x22   :  { %864 = vmatpush3.msk.msra.mxu0 %vm51_vm1, %v46_v14 }
  0x23   :  { %889 = vmatprep.subr.mxu0 %v991_v2 }
  0x93   :  { %v36_v17 = vpop.permute.xlu0 %35 }
  0x94   :  { %vm37_vm3 = vcmp.eq.s32.totalorder %v33_v16, %v36_v17 }
  0x95   :  { %v810_v18 = vsel %vm37_vm3, 1.0, %v991_v2 }
  0x96   :  { %866 = vmatmul.mubr.msk.f32.vlgmr.msra.gmra.mrb[0].mxu0 %vm47_vm2, %v810_v18 }
  0x97   :  { %891 = vmatprep.mubr.msk.f32.mxu0 %vm992_vm0, %v991_v2  ;;  %v129_v20 = vpop.permute.xlu0 %128 }
 0x169   :  { %v121_v21 = vpop.f32.mrb[0].mxu0 }
 0x16a   :  { %v131_v22 = vmul.f32 %v129_v20, %v121_v21  ;;  %v867_v23 = vpop.f32.mrb[1].mxu0 }
 0x16c   :  { %871 = vmatmul.mubr.msk.f32.vlgmr.msra.gmra.mrb[0].mxu1 %vm139_vm4, %v131_v22 }
 0x16d   :  { %875 = vmatprep.mubr.msk.f32.mxu1 %vm992_vm0, %v991_v2 }
 0x23f   :  { %v209_v25 = vpop.f32.mrb[0].mxu1 }
 0x240   :  { %214 = vrot.lane.b32.xlu1 %v209_v25, %s994_s0  ;;  %v872_v26 = vpop.f32.mrb[1].mxu1  ;;  %874 = vmatpush3.msra.mxu1 %v209_v25 }
 0x241   :  { %919 = vmatprep.subr.bf16.mxu1 %v990_v1 }
 0x244   :  { %250 = vperm.xlu1 %943, %v209_v25  }
 0x2b2   :  { %v215_v27 = vpop.permute.xlu1 %214 }
 0x2b3   :  { %217 = vxpose.xlu0.b32.start.end [1/1] (short) (narrow) %v215_v27, 8  ;;  %v582_v27 = vld [vmem:[#allocation2 + $0x70] sm:$0xff] }
 0x2b4   :  { %v926_v29 = vpack.c.bf16 %v583_v28, %v582_v27 }
 0x2c3   :  { %v251_v36 = vpop.permute.xlu1 %250 }
 0x333   :  { %v233_v33 = vpop.trf.xlu0 }
 0x334   :  { %v256_v35 = vrot.slane %v233_v33, %v1064_v32  ;;  %v585_v33 = vld [vmem:[#allocation2 + $0x88] sm:$0xff] }
 0x335   :  { %v929_v34 = vpack.c.bf16 %v585_v33, %v584_v30 }
 0x336   :  { %v257_v37 = vadd.f32 %v256_v35, %v251_v36  ;;  %v995_v35 = vmov 9   ;;  %v819_v36 = vld [vmem:[#allocation2 + $0x68] ss:$0 sm:$0xff] }
 0x338   :  { %v259_v39 = vmul.f32 0.2, %v257_v37  ;;  %vm258_vm5 = vcmp.gt.f32.partialorder %v257_v37, 0.0 }
 0x33a   :  { %v260_v40 = vsel %vm258_vm5, %v257_v37, %v259_v39 }
 0x33b   :  { %v261_v41 = vadd.f32 %v260_v40, %v1068_v38 }
 0x33d   :  { %v262_v42 = vsel %vm139_vm4, %v261_v41, -inf }
 0x33e   :  { %263 = vmax.xlane.f32.xlu1 %v262_v42 }
 0x3cb   :  { %v264_v43 = vpop.xlane.xlu1 %263 }
 0x3cc   :  { %v265_v44 = vsub.f32 %v261_v41, %v264_v43 }
 0x3ce   :  { %v266_v45 = vmul.f32 1.442695, %v265_v44 }
 0x3d0   :  { %946 = vpow2.f32 %v266_v45 }
 0x3da   :  { %v947_v46 = vpop.eup %946 }
 0x3db   :  { %v268_v47 = vmul.f32 %v947_v46, %v1062_v31 }
 0x3dd   :  { %v269_v48 = vsel %vm139_vm4, %v268_v47, 0.0 }
 0x3de   :  { %270 = vadd.xlane.f32.xlu0 %v269_v48 }
 0x46b   :  { %v271_v49 = vpop.xlane.xlu0 %270 }
 0x46c   :  { %v272_v50 = vmax.f32 %v271_v49, 1e-20 }
 0x46e   :  { %948 = vrcp.f32 %v272_v50 }
 0x478   :  { %v949_v51 = vpop.eup %948 }
 0x479   :  { %v274_v52 = vmul.f32 %v949_v51, %v268_v47 }
 0x47b   :  { %876 = vmatmul.mubr.msk.f32.vlgmr.msra.gmra.mrb[2].mxu1 %vm139_vm4, %v274_v52 }
 0x47c   :  { %886 = vmatprep.mubr.msk.f32.mxu1 %vm992_vm0, %v991_v2  ;;  %921 = vmatpush3.bf16.msra.mxu1 %v920_v55 }
 0x47d   :  { %922 = vmatprep.subr.bf16.mxu1 %v990_v1 }
 0x480   :  { %924 = vmatpush3.bf16.msra.mxu1 %v923_v58 }
 0x481   :  { %925 = vmatprep.subr.bf16.mxu1 %v990_v1 }
 0x54e   :  { %v348_v60 = vpop.f32.mrb[2].mxu1 }
 0x54f   :  { %v349_v61 = vadd.f32 %v815_v59, %v348_v60  ;;  %v877_v62 = vpop.f32.mrb[3].mxu1 }
 0x551   :  { %v353_v63 = vmin.f32 %v349_v61, 0.0  ;;  %vm352_vm7 = vcmp.gt.f32.partialorder %v349_v61, 0.0 }
 0x553   :  { %v354_v0 = vmul.f32 1.442695, %v353_v63 }
 0x555   :  { %950 = vpow2.f32 %v354_v0 }
 0x55f   :  { %v951_v3 = vpop.eup %950 }
 0x560   :  { %v817_v4 = vadd.f32 -1.0, %v951_v3 }
 0x562   :  { %v357_v5 = vsel %vm352_vm7, %v349_v61, %v817_v4 }
 0x563   :  { %887 = vmatmul.mubr.msk.f32.vlgmr.msra.gmra.mrb[4].mxu1 %vm363_vm6, %v357_v5 }
 0x564   :  { %902 = vmatprep.mubr.msk.f32.mxu1 %vm992_vm0, %v991_v2  ;;  %927 = vmatpush3.bf16.msra.mxu1 %v926_v29 }
 0x565   :  { %928 = vmatprep.subr.bf16.mxu1 %v990_v1 }
 0x568   :  { %930 = vmatpush3.bf16.msra.mxu1 %v929_v34 }
 0x636   :  { %v433_v6 = vpop.f32.mrb[4].mxu1 }
 0x637   :  { %438 = vrot.lane.b32.xlu1 %v433_v6, %s994_s0  ;;  %v888_v7 = vpop.f32.mrb[5].mxu1  ;;  %890 = vmatpush3.msra.mxu0 %v433_v6 }
 0x638   :  { %905 = vmatprep.subr.mxu0 %v991_v2 }
 0x63b   :  { %474 = vperm.xlu1 %943, %v433_v6  }
 0x6a9   :  { %v439_v8 = vpop.permute.xlu1 %438 }
 0x6aa   :  { %441 = vxpose.xlu1.b32.start.end [1/1] (short) (narrow) %v439_v8, 8 }
 0x6ba   :  { %v475_v9 = vpop.permute.xlu1 %474 }
 0x6c8   :  { %944 = vset.pattern.permute.xlu1 %v995_v35 }
 0x72a   :  { %v457_v10 = vpop.trf.xlu1 }
 0x72b   :  { %v480_v11 = vrot.slane %v457_v10, %v1064_v32 }
 0x72d   :  { %v481_v12 = vadd.f32 %v480_v11, %v475_v9 }
 0x72f   :  { %v483_v13 = vmul.f32 0.2, %v481_v12  ;;  %vm482_vm8 = vcmp.gt.f32.partialorder %v481_v12, 0.0 }
 0x731   :  { %v484_v14 = vsel %vm482_vm8, %v481_v12, %v483_v13 }
 0x732   :  { %v485_v15 = vadd.f32 %v484_v14, %v1068_v38 }
 0x734   :  { %v486_v16 = vsel %vm139_vm4, %v485_v15, -inf }
 0x735   :  { %487 = vmax.xlane.f32.xlu0 %v486_v16 }
 0x7c2   :  { %v488_v17 = vpop.xlane.xlu0 %487 }
 0x7c3   :  { %v489_v18 = vsub.f32 %v485_v15, %v488_v17 }
 0x7c5   :  { %v490_v19 = vmul.f32 1.442695, %v489_v18 }
 0x7c7   :  { %952 = vpow2.f32 %v490_v19 }
 0x7d1   :  { %v953_v20 = vpop.eup %952 }
 0x7d2   :  { %v492_v21 = vmul.f32 %v953_v20, %v1062_v31 }
 0x7d4   :  { %v493_v22 = vsel %vm139_vm4, %v492_v21, 0.0 }
 0x7d5   :  { %494 = vadd.xlane.f32.xlu0 %v493_v22 }
 0x862   :  { %v495_v23 = vpop.xlane.xlu0 %494 }
 0x863   :  { %v496_v24 = vmax.f32 %v495_v23, 1e-20 }
 0x865   :  { %954 = vrcp.f32 %v496_v24 }
 0x86f   :  { %v955_v25 = vpop.eup %954 }
 0x870   :  { %v498_v26 = vmul.f32 %v955_v25, %v492_v21 }
 0x872   :  { %892 = vmatmul.mubr.msk.f32.vlgmr.msra.gmra.mrb[2].mxu0 %vm139_vm4, %v498_v26 }
 0x873   :  { %907 = vmatprep.mubr.msk.f32.mxu0 %vm992_vm0, %v991_v2 }
 0x945   :  { %v572_v37 = vpop.f32.mrb[2].mxu0 }
 0x946   :  { %v573_v39 = vadd.f32 %v819_v36, %v572_v37  ;;  %v893_v40 = vpop.f32.mrb[3].mxu0 }
 0x948   :  { %v577_v41 = vmin.f32 %v573_v39, 0.0  ;;  %vm576_vm9 = vcmp.gt.f32.partialorder %v573_v39, 0.0 }
 0x94a   :  { %v578_v42 = vmul.f32 1.442695, %v577_v41 }
 0x94c   :  { %956 = vpow2.f32 %v578_v42 }
 0x956   :  { %v957_v2 = vpop.eup %956 }
 0x957   :  { %v821_v43 = vadd.f32 -1.0, %v957_v2 }
 0x959   :  { %v581_v44 = vsel %vm576_vm9, %v573_v39, %v821_v43 }
 0x95a   :  { %903 = vmatmul.mubr.msk.f32.vlgmr.msra.gmra.mrb[6].mxu1 %vm363_vm6, %v581_v44 }
 0xa2d   :  { %v656_v1 = vpop.f32.mrb[6].mxu1 }
 0xa2e   :  { %697 = vperm.xlu1 %944, %v656_v1   ;;  %661 = vrot.lane.b32.xlu0 %v656_v1, %s996_s2  ;;  %v904_v45 = vpop.f32.mrb[7].mxu1 }
 0xa2f   :  { %906 = vmatpush3.msra.mxu0 %v656_v1 }
 0xaa0   :  { %v662_v46 = vpop.permute.xlu0 %661 }
 0xaa1   :  { %664 = vxpose.xlu0.b32.start.end [1/1] (short) (narrow) %v662_v46, 8 }
 0xaad   :  { %v698_v49 = vpop.permute.xlu1 %697 }
 0xaca   :  { %945 = vset.pattern.permute.xlu0 %v995_v35 }
 0xb21   :  { %v680_v47 = vpop.trf.xlu0 }
 0xb22   :  { %v703_v48 = vrot.slane %v680_v47, %v1064_v32 }
 0xb24   :  { %v704_v50 = vadd.f32 %v703_v48, %v698_v49 }
 0xb26   :  { %v706_v51 = vmul.f32 0.2, %v704_v50  ;;  %vm705_vm10 = vcmp.gt.f32.partialorder %v704_v50, 0.0 }
 0xb28   :  { %v707_v52 = vsel %vm705_vm10, %v704_v50, %v706_v51 }
 0xb29   :  { %v708_v53 = vadd.f32 %v707_v52, %v1068_v38  ;;  %v823_v38 = vld [vmem:[#allocation2 + $0x90] ss:$0 sm:$0xff] }
 0xb2b   :  { %v709_v54 = vsel %vm139_vm4, %v708_v53, -inf }
 0xb2c   :  { %710 = vmax.xlane.f32.xlu1 %v709_v54 }
 0xbb9   :  { %v711_v55 = vpop.xlane.xlu1 %710 }
 0xbba   :  { %v712_v56 = vsub.f32 %v708_v53, %v711_v55 }
 0xbbc   :  { %v713_v57 = vmul.f32 1.442695, %v712_v56 }
 0xbbe   :  { %958 = vpow2.f32 %v713_v57 }
 0xbc8   :  { %v959_v58 = vpop.eup %958 }
 0xbc9   :  { %v715_v59 = vmul.f32 %v959_v58, %v1062_v31 }
 0xbcb   :  { %v716_v60 = vsel %vm139_vm4, %v715_v59, 0.0 }
 0xbcc   :  { %717 = vadd.xlane.f32.xlu0 %v716_v60 }
 0xc59   :  { %v718_v32 = vpop.xlane.xlu0 %717 }
 0xc5a   :  { %v719_v61 = vmax.f32 %v718_v32, 1e-20 }
 0xc5c   :  { %960 = vrcp.f32 %v719_v61 }
 0xc66   :  { %v961_v62 = vpop.eup %960 }
 0xc67   :  { %v721_v63 = vmul.f32 %v961_v62, %v715_v59 }
 0xc69   :  { %908 = vmatmul.mubr.msk.f32.vlgmr.msra.gmra.mrb[4].mxu0 %vm139_vm4, %v721_v63 }
 0xd3c   :  { %v795_v0 = vpop.f32.mrb[4].mxu0 }
 0xd3d   :  { %v796_v3 = vadd.f32 %v823_v38, %v795_v0  ;;  %v909_v4 = vpop.f32.mrb[5].mxu0 }
 0xd3f   :  { %v799_v5 = vsel %vm139_vm4, %v796_v3, 0.0 }
 0xd40   :  { %800 = vadd.xlane.f32.xlu1 %v799_v5 }
 0xdcd   :  { %v801_v6 = vpop.xlane.xlu1 %800 }
 0xdce   :  { %v802_v31 = vmul.f32 0.125, %v801_v6 }
 0xdd0   :  { %804 = vst.msk [vmem:[%s1108_s4] sm:$0xff] %vm803_vm11, %v802_v31 }
 0xdd1   :  { %809 = vsyncpa [#allocation3], 1 }

</bundles_post_ra>
